<compile_context>
chip_gen: v6e
topology: v6e:2x2x1
jax: 0.10.0
libtpu: 0.0.40
codegen_flags: <defaults>
</compile_context>

<pallas_src>
import functools

import jax
import jax.numpy as jnp
import numpy as np
from jax.experimental import pallas as pl
from jax.experimental.pallas import tpu as pltpu

NUM_CHANNELS = 2
NUM_CLASSES = 1
HIDDEN = 32
CPAD = 8  # input channels zero-padded to one full sublane group


# ----------------------------------------------------------------------------
# Fused Pallas kernel: conv3x3 + ReLU + conv3x3 + ReLU + 1x1 head
# ----------------------------------------------------------------------------
def _fused_seg_kernel(x_ref, m_ref, w1_ref, b1_ref, w2_ref, b2_ref,
                      w3_ref, b3_ref, o_ref, *, wq):
    """One (batch, row-block) step.

    Layout: features along sublanes, flattened (row, col) positions along
    lanes.  A 3x3 tap (dy, dx) is a lane-offset slice at dy*wq + dx.
    """
    l1 = m_ref.shape[1]            # conv1 activation positions per block
    l2 = o_ref.shape[1]            # output positions per block (= th * wq)
    cout = o_ref.shape[0]
    offs = [dy * wq + dx for dy in range(3) for dx in range(3)]

    # ---- conv1: 9 taps packed into the contraction dim (K = 9*CPAD) -------
    xv = x_ref[...]                                         # (CPAD, slab) bf16
    x1 = jnp.concatenate([xv[:, o:o + l1] for o in offs], axis=0)
    acc1 = jnp.dot(w1_ref[...], x1, preferred_element_type=jnp.float32)
    # bias + ReLU in f32, then zero every position whose conv1 center lies
    # outside the true image (reproduces the zero "same" padding conv2 sees).
    h1 = jnp.maximum(acc1 + b1_ref[...], 0.0) * m_ref[...]
    h1 = h1.astype(jnp.bfloat16)                            # (HID, l1)

    # ---- conv2: packed taps again (K = 9*HID), a single MXU dot ------------
    x2 = jnp.concatenate([h1[:, o:o + l2] for o in offs], axis=0)
    acc2 = jnp.dot(w2_ref[...], x2, preferred_element_type=jnp.float32)
    h2 = jnp.maximum(acc2 + b2_ref[...], 0.0)               # (HID, l2) f32

    # ---- 1x1 head on VPU/XLU (sublane reduce), lane-dense store ------------
    w3 = w3_ref[...]
    logits = jnp.concatenate(
        [jnp.sum(h2 * w3[:, c:c + 1], axis=0, keepdims=True)
         for c in range(cout)], axis=0) + b3_ref[...]
    o_ref[...] = logits.astype(o_ref.dtype)


# ----------------------------------------------------------------------------
# Parameters (deterministic, synthetic) and normalization constants
# ----------------------------------------------------------------------------
def _norm_constants(c):
    if c == 1:
        mean, std = [0.5], [0.5]
    elif c == 2:
        mean, std = [0.5, 0.5], [0.5, 0.5]
    elif c == 3:
        mean, std = [0.485, 0.456, 0.406], [0.229, 0.224, 0.225]
    else:
        mean, std = [0.5] * c, [0.5] * c
    return jnp.asarray(mean, jnp.float32), jnp.asarray(std, jnp.float32)


def init_params(key, in_channels=NUM_CHANNELS, hidden=HIDDEN,
                out_classes=NUM_CLASSES):
    k1, k2, k3 = jax.random.split(key, 3)
    # conv weights are stored tap-major: (9, C_in, C_out)
    w1 = jax.random.normal(k1, (9, in_channels, hidden), jnp.float32) / \
        jnp.sqrt(9.0 * in_channels)
    b1 = jnp.zeros((1, hidden), jnp.float32)
    w2 = jax.random.normal(k2, (9, hidden, hidden), jnp.float32) / \
        jnp.sqrt(9.0 * hidden)
    b2 = jnp.zeros((1, hidden), jnp.float32)
    w3 = jax.random.normal(k3, (hidden, out_classes), jnp.float32) / \
        jnp.sqrt(float(hidden))
    b3 = jnp.zeros((1, out_classes), jnp.float32)
    return dict(w1=w1, b1=b1, w2=w2, b2=b2, w3=w3, b3=b3)


def _default_row_tile():
    """64 output rows per step on 128-MiB-VMEM parts (v5e/v6e), else 32."""
    try:
        info = pltpu.get_tpu_info()
        vmem = getattr(info, "vmem_capacity_bytes", 0) or 0
        if vmem >= 100 * 1024 * 1024:
            return 64
    except Exception:
        pass
    return 32


# ----------------------------------------------------------------------------
# Forward pass (CamVidModel.forward)
# ----------------------------------------------------------------------------
def camvid_forward(params, image, *, row_tile=None):
    """image: (B, C_in, H, W) float32 NCHW -> mask: (B, out_classes, H, W)."""
    B, C, H, W = image.shape
    assert W >= 6, "kernel assumes image width >= 6"
    assert C <= CPAD
    hid = params["w1"].shape[-1]
    cout = params["w3"].shape[-1]

    if row_tile is None:
        row_tile = _default_row_tile()
    assert row_tile % 8 == 0

    mean, std = _norm_constants(C)

    # Row tile: cap at the 8-rounded image height; ensure >=2 grid steps so
    # both v7x TensorCores get work even for batch 1.
    th = min(row_tile, ((H + 7) // 8) * 8)
    nblk = (H + th - 1) // th
    if B * nblk < 2 and H > 8:
        th = max(8, (((H + 1) // 2) + 7) // 8 * 8)
        nblk = (H + th - 1) // th
    h_pad = nblk * th

    wq = W + 4                      # row width incl. 2-pixel halo each side
    slab = (th + 5) * wq            # flattened input positions per block
    l1 = (th + 2) * wq + 8          # conv1 activation positions per block
    l2 = th * wq                    # output positions per block

    # ---- host-side prep (tiny vs. the activations; fuses into a few XLA ops)
    # Subtract the mean here; 1/std is folded into the conv1 weights below.
    x = image.astype(jnp.float32) - mean[None, :, None, None]
    # Pad channels -> CPAD (makes the in-kernel tap concat sublane-aligned),
    # rows -> 2-row top halo + enough bottom rows, cols -> 2-col halo.
    xp = jnp.pad(x, ((0, 0), (0, CPAD - C), (2, 3 + h_pad - H), (2, 2)))
    # Overlapping (th+5)-row slabs, flattened per channel (positions in lanes).
    # TODO(synk): the overlapping-slab copy (~16% halo duplication of the
    # small input) could be removed with a manual-DMA window walk.
    xb = jnp.stack([xp[:, :, i * th:i * th + th + 5, :] for i in range(nblk)],
                   axis=1)
    xb = xb.reshape(B, nblk, CPAD, slab).astype(jnp.bfloat16)

    # Packed weights: conv taps stacked along the MXU contraction dimension.
    w1 = params["w1"] / std[None, :, None]                       # (9, C, hid)
    w1 = jnp.pad(w1, ((0, 0), (0, CPAD - C), (0, 0)))             # (9, CPAD, hid)
    w1p = jnp.transpose(w1, (2, 0, 1)).reshape(hid, 9 * CPAD)
    w1p = w1p.astype(jnp.bfloat16)
    w2p = jnp.transpose(params["w2"], (2, 0, 1)).reshape(hid, 9 * hid)
    w2p = w2p.astype(jnp.bfloat16)
    b1c = params["b1"].reshape(hid, 1).astype(jnp.float32)
    b2c = params["b2"].reshape(hid, 1).astype(jnp.float32)
    w3f = params["w3"].astype(jnp.float32)                        # (hid, cout)
    b3c = params["b3"].reshape(cout, 1).astype(jnp.float32)

    # Lane-dense 0/1 border mask, one (1, l1) row per row block (host-built,
    # tiny): position p valid iff its conv1 center lies inside the image.
    p = np.arange(l1)
    rho = p // wq
    c1 = p - rho * wq
    col_ok = (c1 >= 1) & (c1 <= W)
    rows = []
    for i in range(nblk):
        y1 = i * th + rho - 1
        rows.append((col_ok & (y1 >= 0) & (y1 < H)).astype(np.float32))
    mask = jnp.asarray(np.stack(rows, axis=0)[:, None, :])        # (nblk, 1, l1)

    kernel = functools.partial(_fused_seg_kernel, wq=wq)
    vmem_limit = (64 if row_tile >= 64 else 32) * 1024 * 1024
    out = pl.pallas_call(
        kernel,
        out_shape=jax.ShapeDtypeStruct((B, nblk, cout, l2), jnp.float32),
        grid_spec=pltpu.PrefetchScalarGridSpec(
            num_scalar_prefetch=0,
            grid=(B, nblk),
            in_specs=[
                pl.BlockSpec((None, None, CPAD, slab),
                             lambda b, i: (b, i, 0, 0)),
                pl.BlockSpec((None, 1, l1), lambda b, i: (i, 0, 0)),
                pl.BlockSpec((hid, 9 * CPAD), lambda b, i: (0, 0)),
                pl.BlockSpec((hid, 1), lambda b, i: (0, 0)),
                pl.BlockSpec((hid, 9 * hid), lambda b, i: (0, 0)),
                pl.BlockSpec((hid, 1), lambda b, i: (0, 0)),
                pl.BlockSpec((hid, cout), lambda b, i: (0, 0)),
                pl.BlockSpec((cout, 1), lambda b, i: (0, 0)),
            ],
            out_specs=pl.BlockSpec((None, None, cout, l2),
                                   lambda b, i: (b, i, 0, 0)),
        ),
        compiler_params=pltpu.CompilerParams(
            dimension_semantics=("parallel", "parallel"),
            vmem_limit_bytes=vmem_limit,
        ),
    )(xb, mask, w1p, b1c, w2p, b2c, w3f, b3c)

    # (B, nblk, cout, th*wq) -> (B, cout, H, W)  (NCHW)
    out = out.reshape(B, nblk, cout, th, wq)
    out = jnp.transpose(out, (0, 2, 1, 3, 4)).reshape(B, cout, h_pad, wq)
    return out[:, :, :H, :W]


# ----------------------------------------------------------------------------
# Pure-JAX f32 reference of the same synthetic network (for validation)
# ----------------------------------------------------------------------------
def _reference_forward(params, image):
    B, C, H, W = image.shape
    mean, std = _norm_constants(C)
    x = (image.astype(jnp.float32) - mean[None, :, None, None]) / \
        std[None, :, None, None]
    x = jnp.transpose(x, (0, 2, 3, 1))                # NHWC

    def conv3x3(t, w, b):
        co = w.shape[2]
        tp = jnp.pad(t, ((0, 0), (1, 1), (1, 1), (0, 0)))
        acc = jnp.zeros(t.shape[:3] + (co,), jnp.float32)
        for dy in range(3):
            for dx in range(3):
                acc = acc + tp[:, dy:dy + H, dx:dx + W, :] @ w[dy * 3 + dx]
        return acc + b.reshape(1, 1, 1, co)

    h1 = jax.nn.relu(conv3x3(x, params["w1"], params["b1"]))
    h2 = jax.nn.relu(conv3x3(h1, params["w2"], params["b2"]))
    logits = h2 @ params["w3"] + params["b3"].reshape(1, 1, 1, -1)
    return jnp.transpose(logits, (0, 3, 1, 2))


if __name__ == "__main__":
    key = jax.random.PRNGKey(0)
    k_param, k_img = jax.random.split(key)

    B, C, H, W = 2, NUM_CHANNELS, 16, 16
    image = jax.random.uniform(k_img, (B, C, H, W), jnp.float32)

    params = init_params(k_param)

    mask = jax.jit(camvid_forward)(params, image)
    mask = jax.block_until_ready(mask)

    assert mask.shape == (B, NUM_CLASSES, H, W), mask.shape
    assert mask.dtype == jnp.float32
    assert bool(jnp.all(jnp.isfinite(mask)))

    # Validate against a plain-JAX f32 reference (bf16 MXU path => loose tol).
    ref = _reference_forward(params, image)
    np.testing.assert_allclose(np.asarray(mask), np.asarray(ref),
                               rtol=5e-2, atol=5e-2)

    print("KERNEL_OK")
</pallas_src>

<mosaic_0001>
module attributes {stable_mosaic.version = 11 : i64} {
  func.func @_fused_seg_kernel(%arg0: i32, %arg1: i32, %arg2: memref<1x1x8x420xbf16, #tpu.memory_space<vmem>>, %arg3: memref<1x1x368xf32, #tpu.memory_space<vmem>>, %arg4: memref<32x72xbf16, #tpu.memory_space<vmem>>, %arg5: memref<32x1xf32, #tpu.memory_space<vmem>>, %arg6: memref<32x288xbf16, #tpu.memory_space<vmem>>, %arg7: memref<32x1xf32, #tpu.memory_space<vmem>>, %arg8: memref<32x1xf32, #tpu.memory_space<vmem>>, %arg9: memref<1x1xf32, #tpu.memory_space<vmem>>, %arg10: memref<1x1x1x320xf32, #tpu.memory_space<vmem>>) attributes {dimension_semantics = [#tpu.dimension_semantics<parallel>, #tpu.dimension_semantics<parallel>], iteration_bounds = array<i64: 2, 1>, scalar_prefetch = 0 : i64, scratch_operands = 0 : i64, tpu.core_type = #tpu.core_type<tc>, window_params = [{transform_indices = @transform_0, window_bounds = array<i64: 1, 1, 8, 420>}, {transform_indices = @transform_1, window_bounds = array<i64: 1, 1, 368>}, {pipeline_mode = #tpu.pipeline_mode<synchronous>, transform_indices = @transform_2, window_bounds = array<i64: 32, 72>}, {pipeline_mode = #tpu.pipeline_mode<synchronous>, transform_indices = @transform_3, window_bounds = array<i64: 32, 1>}, {pipeline_mode = #tpu.pipeline_mode<synchronous>, transform_indices = @transform_4, window_bounds = array<i64: 32, 288>}, {pipeline_mode = #tpu.pipeline_mode<synchronous>, transform_indices = @transform_5, window_bounds = array<i64: 32, 1>}, {pipeline_mode = #tpu.pipeline_mode<synchronous>, transform_indices = @transform_6, window_bounds = array<i64: 32, 1>}, {pipeline_mode = #tpu.pipeline_mode<synchronous>, transform_indices = @transform_7, window_bounds = array<i64: 1, 1>}, {transform_indices = @transform_8, window_bounds = array<i64: 1, 1, 1, 320>}]} {
    %c0 = arith.constant 0 : index
    %c0_0 = arith.constant 0 : index
    %c0_1 = arith.constant 0 : index
    %c0_2 = arith.constant 0 : index
    %0 = vector.load %arg2[%c0, %c0_0, %c0_1, %c0_2] : memref<1x1x8x420xbf16, #tpu.memory_space<vmem>>, vector<1x1x8x420xbf16>
    %1 = vector.shape_cast %0 : vector<1x1x8x420xbf16> to vector<8x420xbf16>
    %2 = vector.extract_strided_slice %1 {offsets = [0, 0], sizes = [8, 368], strides = [1, 1]} : vector<8x420xbf16> to vector<8x368xbf16>
    %3 = vector.extract_strided_slice %1 {offsets = [0, 1], sizes = [8, 368], strides = [1, 1]} : vector<8x420xbf16> to vector<8x368xbf16>
    %4 = vector.extract_strided_slice %1 {offsets = [0, 2], sizes = [8, 368], strides = [1, 1]} : vector<8x420xbf16> to vector<8x368xbf16>
    %5 = vector.extract_strided_slice %1 {offsets = [0, 20], sizes = [8, 368], strides = [1, 1]} : vector<8x420xbf16> to vector<8x368xbf16>
    %6 = vector.extract_strided_slice %1 {offsets = [0, 21], sizes = [8, 368], strides = [1, 1]} : vector<8x420xbf16> to vector<8x368xbf16>
    %7 = vector.extract_strided_slice %1 {offsets = [0, 22], sizes = [8, 368], strides = [1, 1]} : vector<8x420xbf16> to vector<8x368xbf16>
    %8 = vector.extract_strided_slice %1 {offsets = [0, 40], sizes = [8, 368], strides = [1, 1]} : vector<8x420xbf16> to vector<8x368xbf16>
    %9 = vector.extract_strided_slice %1 {offsets = [0, 41], sizes = [8, 368], strides = [1, 1]} : vector<8x420xbf16> to vector<8x368xbf16>
    %10 = vector.extract_strided_slice %1 {offsets = [0, 42], sizes = [8, 368], strides = [1, 1]} : vector<8x420xbf16> to vector<8x368xbf16>
    %11 = tpu.concatenate %2, %3, %4, %5, %6, %7, %8, %9, %10 in 0 : vector<8x368xbf16>, vector<8x368xbf16>, vector<8x368xbf16>, vector<8x368xbf16>, vector<8x368xbf16>, vector<8x368xbf16>, vector<8x368xbf16>, vector<8x368xbf16>, vector<8x368xbf16> -> vector<72x368xbf16>
    %c0_3 = arith.constant 0 : index
    %c0_4 = arith.constant 0 : index
    %12 = vector.load %arg4[%c0_3, %c0_4] : memref<32x72xbf16, #tpu.memory_space<vmem>>, vector<32x72xbf16>
    %cst = arith.constant dense<0.000000e+00> : vector<32x368xf32>
    %13 = tpu.matmul %12, %11, %cst {dimension_numbers = #tpu.dot_dimension_numbers<[1], [0], [0], [1], [0, 0, 1, 1], [], []>} : vector<32x72xbf16>, vector<72x368xbf16>, vector<32x368xf32> -> vector<32x368xf32>
    %c0_5 = arith.constant 0 : index
    %c0_6 = arith.constant 0 : index
    %14 = vector.load %arg5[%c0_5, %c0_6] : memref<32x1xf32, #tpu.memory_space<vmem>>, vector<32x1xf32>
    %15 = vector.broadcast %14 : vector<32x1xf32> to vector<32x368xf32>
    %16 = arith.addf %13, %15 : vector<32x368xf32>
    %cst_7 = arith.constant 0.000000e+00 : f32
    %17 = vector.broadcast %cst_7 : f32 to vector<32x368xf32>
    %18 = arith.maximumf %16, %17 : vector<32x368xf32>
    %c0_8 = arith.constant 0 : index
    %c0_9 = arith.constant 0 : index
    %c0_10 = arith.constant 0 : index
    %19 = vector.load %arg3[%c0_8, %c0_9, %c0_10] : memref<1x1x368xf32, #tpu.memory_space<vmem>>, vector<1x1x368xf32>
    %20 = vector.shape_cast %19 : vector<1x1x368xf32> to vector<1x368xf32>
    %21 = vector.broadcast %20 : vector<1x368xf32> to vector<32x368xf32>
    %22 = arith.mulf %18, %21 : vector<32x368xf32>
    %23 = arith.truncf %22 : vector<32x368xf32> to vector<32x368xbf16>
    %24 = vector.extract_strided_slice %23 {offsets = [0, 0], sizes = [32, 320], strides = [1, 1]} : vector<32x368xbf16> to vector<32x320xbf16>
    %25 = vector.extract_strided_slice %23 {offsets = [0, 1], sizes = [32, 320], strides = [1, 1]} : vector<32x368xbf16> to vector<32x320xbf16>
    %26 = vector.extract_strided_slice %23 {offsets = [0, 2], sizes = [32, 320], strides = [1, 1]} : vector<32x368xbf16> to vector<32x320xbf16>
    %27 = vector.extract_strided_slice %23 {offsets = [0, 20], sizes = [32, 320], strides = [1, 1]} : vector<32x368xbf16> to vector<32x320xbf16>
    %28 = vector.extract_strided_slice %23 {offsets = [0, 21], sizes = [32, 320], strides = [1, 1]} : vector<32x368xbf16> to vector<32x320xbf16>
    %29 = vector.extract_strided_slice %23 {offsets = [0, 22], sizes = [32, 320], strides = [1, 1]} : vector<32x368xbf16> to vector<32x320xbf16>
    %30 = vector.extract_strided_slice %23 {offsets = [0, 40], sizes = [32, 320], strides = [1, 1]} : vector<32x368xbf16> to vector<32x320xbf16>
    %31 = vector.extract_strided_slice %23 {offsets = [0, 41], sizes = [32, 320], strides = [1, 1]} : vector<32x368xbf16> to vector<32x320xbf16>
    %32 = vector.extract_strided_slice %23 {offsets = [0, 42], sizes = [32, 320], strides = [1, 1]} : vector<32x368xbf16> to vector<32x320xbf16>
    %33 = tpu.concatenate %24, %25, %26, %27, %28, %29, %30, %31, %32 in 0 : vector<32x320xbf16>, vector<32x320xbf16>, vector<32x320xbf16>, vector<32x320xbf16>, vector<32x320xbf16>, vector<32x320xbf16>, vector<32x320xbf16>, vector<32x320xbf16>, vector<32x320xbf16> -> vector<288x320xbf16>
    %c0_11 = arith.constant 0 : index
    %c0_12 = arith.constant 0 : index
    %34 = vector.load %arg6[%c0_11, %c0_12] : memref<32x288xbf16, #tpu.memory_space<vmem>>, vector<32x288xbf16>
    %cst_13 = arith.constant dense<0.000000e+00> : vector<32x320xf32>
    %35 = tpu.matmul %34, %33, %cst_13 {dimension_numbers = #tpu.dot_dimension_numbers<[1], [0], [0], [1], [0, 0, 1, 1], [], []>} : vector<32x288xbf16>, vector<288x320xbf16>, vector<32x320xf32> -> vector<32x320xf32>
    %c0_14 = arith.constant 0 : index
    %c0_15 = arith.constant 0 : index
    %36 = vector.load %arg7[%c0_14, %c0_15] : memref<32x1xf32, #tpu.memory_space<vmem>>, vector<32x1xf32>
    %37 = vector.broadcast %36 : vector<32x1xf32> to vector<32x320xf32>
    %38 = arith.addf %35, %37 : vector<32x320xf32>
    %cst_16 = arith.constant 0.000000e+00 : f32
    %39 = vector.broadcast %cst_16 : f32 to vector<32x320xf32>
    %40 = arith.maximumf %38, %39 : vector<32x320xf32>
    %c0_17 = arith.constant 0 : index
    %c0_18 = arith.constant 0 : index
    %41 = vector.load %arg8[%c0_17, %c0_18] : memref<32x1xf32, #tpu.memory_space<vmem>>, vector<32x1xf32>
    %42 = vector.broadcast %41 : vector<32x1xf32> to vector<32x320xf32>
    %43 = arith.mulf %40, %42 : vector<32x320xf32>
    %cst_19 = arith.constant dense<0.000000e+00> : vector<320xf32>
    %44 = vector.multi_reduction <add>, %43, %cst_19 [0] : vector<32x320xf32> to vector<320xf32>
    %45 = vector.shape_cast %44 : vector<320xf32> to vector<1x320xf32>
    %c0_20 = arith.constant 0 : index
    %c0_21 = arith.constant 0 : index
    %46 = vector.load %arg9[%c0_20, %c0_21] : memref<1x1xf32, #tpu.memory_space<vmem>>, vector<1x1xf32>
    %47 = vector.broadcast %46 : vector<1x1xf32> to vector<1x320xf32>
    %48 = arith.addf %45, %47 : vector<1x320xf32>
    %c0_22 = arith.constant 0 : index
    %c0_23 = arith.constant 0 : index
    %c0_24 = arith.constant 0 : index
    %c0_25 = arith.constant 0 : index
    %49 = vector.load %arg10[%c0_22, %c0_23, %c0_24, %c0_25] : memref<1x1x1x320xf32, #tpu.memory_space<vmem>>, vector<1x1x1x320xf32>
    %50 = vector.shape_cast %49 : vector<1x1x1x320xf32> to vector<1x320xf32>
    %51 = vector.shape_cast %48 : vector<1x320xf32> to vector<1x1x1x320xf32>
    tpu.vector_store %arg10[%c0_22, %c0_23, %c0_24, %c0_25], %51 {strides = array<i32>} : memref<1x1x1x320xf32, #tpu.memory_space<vmem>>, vector<1x1x1x320xf32>,
    return
  }
  func.func @transform_0(%arg0: i32, %arg1: i32) -> (i32, i32, i32, i32) {
    %c0_i32 = arith.constant 0 : i32
    %c0_i32_0 = arith.constant 0 : i32
    %c0_i32_1 = arith.constant 0 : i32
    return %arg0, %arg1, %c0_i32, %c0_i32_0 : i32, i32, i32, i32
  }
  func.func @transform_1(%arg0: i32, %arg1: i32) -> (i32, i32, i32) {
    %c0_i32 = arith.constant 0 : i32
    %c0_i32_0 = arith.constant 0 : i32
    %c0_i32_1 = arith.constant 0 : i32
    return %arg1, %c0_i32, %c0_i32_0 : i32, i32, i32
  }
  func.func @transform_2(%arg0: i32, %arg1: i32) -> (i32, i32) {
    %c0_i32 = arith.constant 0 : i32
    %c0_i32_0 = arith.constant 0 : i32
    %c0_i32_1 = arith.constant 0 : i32
    return %c0_i32, %c0_i32_0 : i32, i32
  }
  func.func @transform_3(%arg0: i32, %arg1: i32) -> (i32, i32) {
    %c0_i32 = arith.constant 0 : i32
    %c0_i32_0 = arith.constant 0 : i32
    %c0_i32_1 = arith.constant 0 : i32
    return %c0_i32, %c0_i32_0 : i32, i32
  }
  func.func @transform_4(%arg0: i32, %arg1: i32) -> (i32, i32) {
    %c0_i32 = arith.constant 0 : i32
    %c0_i32_0 = arith.constant 0 : i32
    %c0_i32_1 = arith.constant 0 : i32
    return %c0_i32, %c0_i32_0 : i32, i32
  }
  func.func @transform_5(%arg0: i32, %arg1: i32) -> (i32, i32) {
    %c0_i32 = arith.constant 0 : i32
    %c0_i32_0 = arith.constant 0 : i32
    %c0_i32_1 = arith.constant 0 : i32
    return %c0_i32, %c0_i32_0 : i32, i32
  }
  func.func @transform_6(%arg0: i32, %arg1: i32) -> (i32, i32) {
    %c0_i32 = arith.constant 0 : i32
    %c0_i32_0 = arith.constant 0 : i32
    %c0_i32_1 = arith.constant 0 : i32
    return %c0_i32, %c0_i32_0 : i32, i32
  }
  func.func @transform_7(%arg0: i32, %arg1: i32) -> (i32, i32) {
    %c0_i32 = arith.constant 0 : i32
    %c0_i32_0 = arith.constant 0 : i32
    %c0_i32_1 = arith.constant 0 : i32
    return %c0_i32, %c0_i32_0 : i32, i32
  }
  func.func @transform_8(%arg0: i32, %arg1: i32) -> (i32, i32, i32, i32) {
    %c0_i32 = arith.constant 0 : i32
    %c0_i32_0 = arith.constant 0 : i32
    %c0_i32_1 = arith.constant 0 : i32
    return %arg0, %arg1, %c0_i32, %c0_i32_0 : i32, i32, i32, i32
  }
}

</mosaic_0001>

<bundles_post_ra>
// kernel: camvid_forward.1
= control target key start
LH: loop header
LB: loop body
LE: loop exit
PB: predicated region body
PF: predicated region fallthrough
CT: control target
= control target key end

     0   :  { %s1623_s29 = smov 0   ;;  %s1625_s30 = smov 0   ;;  %s2062_s0 = inlined_call_operand.vmem [shape: bf16[2,1,8,420], index: 0, kind: input, shape index: {}]   ;;  %s2063_s1 = inlined_call_operand.vmem [shape: f32[1,1,368], index: 1, kind: input, shape index: {}]   ;;  %s2064_s2 = inlined_call_operand.vmem [shape: bf16[32,72], index: 2, kind: input, shape index: {}]   ;;  %s2065_s3 = inlined_call_operand.vmem [shape: f32[32,1], index: 3, kind: input, shape index: {}]   ;;  %s2066_s4 = inlined_call_operand.vmem [shape: bf16[32,288], index: 4, kind: input, shape index: {}]   ;;  %s2067_s5 = inlined_call_operand.vmem [shape: f32[32,1], index: 5, kind: input, shape index: {}]   ;;  %s2068_s6 = inlined_call_operand.vmem [shape: f32[32,1], index: 6, kind: input, shape index: {}]   ;;  %s2069_s7 = inlined_call_operand.<no memory space> [shape: f32[1,1], index: 7, kind: input, shape index: {}]   ;;  %s2070_s8 = inlined_call_operand.vmem [shape: f32[2,1,1,320], index: 8, kind: output, shape index: {}]  }
   0x1   :  { %v13_v0 = vstv %s2069_s7  ;;  %s1627_s9 = smov 0  }
   0x2   :  { %14 = vst [vmem:[#allocation2] sm:$0x1] %v13_v0 }
   0x3 LB: > { %s32_s7 = sadd.s32 1, %s1559_s30  ;;  %p1401_p0 = scmp.ge.s32.totalorder %s1563_s9, 1  ;;  %s1563_s9 = sphi %s1627_s9, %s20_s9   ;;  %s1559_s30 = sphi %s1625_s30, %s2072_s30   ;;  %s1555_s29 = sphi %s1623_s29, %s2071_s29  }
   0x4   : > { %p34_p1 = scmp.ge.s32.totalorder %s32_s7, 2  ;;  %p293_p2 = scmp.lt.s32.totalorder %s1563_s9, 3 }
   0x6   : > { %s2074_s7 = smov (%p34_p1, %s32_s7), 0  ;;  %p294_p3 = pnand %p1401_p0, %p293_p2 }
   0x7   : > { %p338_p4 = scmp.lt.s32.totalorder (!%p294_p3), %s1555_s29, 1  ;;  %s1565_s14 = smov (!%p294_p3), 86  }
   0x8   : > { %297 = sbr.rel (%p294_p3) target bundleno = 860 (0x35c), region = 52  ;;  %s1566_s15 = smov (!%p294_p3), 88  }
   0x9   : > { %s1567_s16 = smov (!%p294_p3), 87   ;;  %s1568_s17 = smov (!%p294_p3), 107  }
   0xa   : > { %s1569_s18 = smov (!%p294_p3), 106   ;;  %s1570_s19 = smov (!%p294_p3), 126  }
   0xb   : > { %s1571_s20 = smov (!%p294_p3), 108   ;;  %s1573_s23 = smov (!%p294_p3), 127  }
   0xd   : > { %s2076_s29 = smov (!%p338_p4, %s1555_s29), 1  ;;  %v1572_v7 = vmov 0   ;;  %v1700_v8 = vld [vmem:[%s2064_s2] sm:$0xff]   ;;  %vm549_vm0 = vcmask 588800   ;;  %v518_v9 = vld [vmem:[%s2065_s3 + $0x18] sm:$0xff]  ;;  %v517_v10 = vld [vmem:[%s2065_s3 + $0x10] sm:$0xff] }
   0xe   : > { %s1427_s10 = sshll.u32 %s2076_s29, 4  ;;  %597 = vmatprep.mubr.bf16.mxu0 %v1572_v7  ;;  %1526 = vset.pattern.permute.xlu1 %v1572_v7  ;;  %v515_v11 = vld [vmem:[%s2065_s3] sm:$0xff]  ;;  %v516_v12 = vld [vmem:[%s2065_s3 + $0x8] sm:$0xff]  ;;  %vm458_vm1 = vcmask 703488   ;;  %vm462_vm2 = vcmask 1043456   ;;  %vm434_vm3 = vcmask 719872  }
   0xf   : > { %s346_s13 = scalar_lea.vmem %s2062_s0, %s1427_s10  ;;  %1477 = vmatprep.mubr.msk.bf16.mxu1 %vm549_vm0, %v1700_v8  ;;  %1525 = vset.pattern.permute.xlu0 %v1572_v7  ;;  %vm446_vm4 = vcmask 711680   ;;  %vm410_vm5 = vcmask 875520   ;;  %vm422_vm6 = vcmask 867328   ;;  %vm385_vm7 = vcmask 1031168   ;;  %s1490_s27 = smul.u32 3, %s2076_s29 }
  0x10   : > { %v361_v1 = vld [vmem:[%s346_s13 + $0x8] sm:$0xff]  ;;  %v360_v2 = vld [vmem:[%s346_s13] sm:$0xff]  ;;  %vm398_vm8 = vcmask 883712   ;;  %vm376_vm9 = vcmask 1039360   ;;  %vm958_vm10 = vcmask 261120   ;;  %vm1235_vm11 = vcmask 523264  }
  0x11   : > { %v1647_v3 = vcombine.low %v361_v1, %v361_v1  ;;  %v1649_v4 = vcombine.low %v360_v2, %v360_v2  ;;  %v1655_v5 = vcombine.high %v360_v2, %v360_v2  ;;  %v1407_v6 = vcombine.high %v361_v1, %v361_v1 }
  0x13   : > { %454 = vrot.lane.b32.xlu1 %v1647_v3, %s1565_s14  ;;  %450 = vrot.lane.b32.xlu0 %v1649_v4, %s1565_s14 }
  0x17   : > { %428 = vrot.lane.b32.xlu1 %v1655_v5, %s1566_s15  ;;  %452 = vrot.lane.b32.xlu0 %v1655_v5, %s1565_s14 }
  0x1b   : > { %440 = vrot.lane.b32.xlu1 %v1655_v5, %s1567_s16  ;;  %430 = vrot.lane.b32.xlu0 %v1647_v3, %s1566_s15 }
  0x1f   : > { %426 = vrot.lane.b32.xlu1 %v1649_v4, %s1566_s15  ;;  %442 = vrot.lane.b32.xlu0 %v1647_v3, %s1567_s16 }
  0x23   : > { %404 = vrot.lane.b32.xlu1 %v1655_v5, %s1568_s17  ;;  %438 = vrot.lane.b32.xlu0 %v1649_v4, %s1567_s16 }
  0x27   : > { %416 = vrot.lane.b32.xlu1 %v1655_v5, %s1569_s18  ;;  %406 = vrot.lane.b32.xlu0 %v1647_v3, %s1568_s17 }
  0x2b   : > { %402 = vrot.lane.b32.xlu1 %v1649_v4, %s1568_s17  ;;  %418 = vrot.lane.b32.xlu0 %v1647_v3, %s1569_s18 }
  0x2f   : > { %456 = vrot.lane.b32.xlu1 %v1407_v6, %s1565_s14  ;;  %414 = vrot.lane.b32.xlu0 %v1649_v4, %s1569_s18 }
  0x33   : > { %383 = vrot.lane.b32.xlu1 %v1647_v3, %s1570_s19  ;;  %381 = vrot.lane.b32.xlu0 %v1655_v5, %s1570_s19 }
  0x37   : > { %394 = vrot.lane.b32.xlu1 %v1647_v3, %s1571_s20  ;;  %392 = vrot.lane.b32.xlu0 %v1655_v5, %s1571_s20 }
  0x3b   : > { %390 = vrot.lane.b32.xlu1 %v1649_v4, %s1571_s20  ;;  %379 = vrot.lane.b32.xlu0 %v1649_v4, %s1570_s19 }
  0x3f   : > { %444 = vrot.lane.b32.xlu1 %v1407_v6, %s1567_s16  ;;  %432 = vrot.lane.b32.xlu0 %v1407_v6, %s1566_s15 }
  0x43   : > { %374 = vrot.lane.b32.xlu1 %v1647_v3, %s1573_s23  ;;  %372 = vrot.lane.b32.xlu0 %v1655_v5, %s1573_s23 }
  0x47   : > { %408 = vrot.lane.b32.xlu1 %v1407_v6, %s1568_s17  ;;  %370 = vrot.lane.b32.xlu0 %v1649_v4, %s1573_s23 }
  0x4b   : > { %396 = vrot.lane.b32.xlu1 %v1407_v6, %s1571_s20  ;;  %420 = vrot.lane.b32.xlu0 %v1407_v6, %s1569_s18 }
  0x4f   : > { %536 = vperm.xlu1 %1526, %v518_v9   ;;  %531 = vperm.xlu0 %1525, %v517_v10  }
  0x53   : > { %521 = vperm.xlu1 %1526, %v515_v11   ;;  %526 = vperm.xlu0 %1525, %v516_v12  }
  0x85   : > { %v455_v13 = vpop.permute.xlu1 %454  ;;  %v451_v14 = vpop.permute.xlu0 %450 }
  0x89   : > { %v429_v15 = vpop.permute.xlu1 %428  ;;  %v453_v16 = vpop.permute.xlu0 %452 }
  0x8a   : > { %v460_v17 = vsel %vm458_vm1, %v453_v16, %v455_v13  ;;  %v459_v18 = vsel %vm458_vm1, %v451_v14, %v453_v16 }
  0x8b   : > { %1410 = vmatprep.subr.msk.bf16.mxu0 %vm462_vm2, %v460_v17  ;;  %v557_v19 = vsel %vm462_vm2, %v459_v18, 0  ;;  %v1532_v17 = vld [vmem:[%s2064_s2 + $0x8] sm:$0xff]  }
  0x8c   : > { %572 = vmatpush1.bf16.msra.mxu0 %v557_v19 }
  0x8d   : > { %v441_v20 = vpop.permute.xlu1 %440  ;;  %v431_v21 = vpop.permute.xlu0 %430 }
  0x8e   : > { %v436_v24 = vsel %vm434_vm3, %v429_v15, %v431_v21 }
  0x91   : > { %v427_v22 = vpop.permute.xlu1 %426  ;;  %v443_v23 = vpop.permute.xlu0 %442 }
  0x92   : > { %v448_v25 = vsel %vm446_vm4, %v441_v20, %v443_v23  ;;  %v435_v29 = vsel %vm434_vm3, %v427_v22, %v429_v15 }
  0x93   : > { %v505_v26 = vsel %vm462_vm2, %v436_v24, %v448_v25  ;;  %v679_v24 = vld [vmem:[%s2063_s1] sm:$0x7] }
  0x94   : > { %573 = vmatprep.subr.bf16.mxu0 %v505_v26 }
  0x95   : > { %v405_v27 = vpop.permute.xlu1 %404  ;;  %v439_v28 = vpop.permute.xlu0 %438 }
  0x96   : > { %v447_v30 = vsel %vm446_vm4, %v439_v28, %v441_v20 }
  0x97   : > { %v501_v31 = vsel %vm462_vm2, %v435_v29, %v447_v30 }
  0x98   : > { %574 = vmatpush1.bf16.msra.mxu0 %v501_v31 }
  0x99   : > { %v417_v32 = vpop.permute.xlu1 %416  ;;  %v407_v33 = vpop.permute.xlu0 %406 }
  0x9a   : > { %v412_v36 = vsel %vm410_vm5, %v405_v27, %v407_v33 }
  0x9d   : > { %v403_v34 = vpop.permute.xlu1 %402  ;;  %v419_v35 = vpop.permute.xlu0 %418 }
  0x9e   : > { %v424_v37 = vsel %vm422_vm6, %v417_v32, %v419_v35  ;;  %v411_v41 = vsel %vm410_vm5, %v403_v34, %v405_v27 }
  0x9f   : > { %v493_v38 = vsel %vm462_vm2, %v412_v36, %v424_v37 }
  0xa0   : > { %575 = vmatprep.subr.bf16.mxu0 %v493_v38 }
  0xa1   : > { %v457_v39 = vpop.permute.xlu1 %456  ;;  %v415_v40 = vpop.permute.xlu0 %414 }
  0xa2   : > { %v423_v42 = vsel %vm422_vm6, %v415_v40, %v417_v32  ;;  %v461_v43 = vsel %vm458_vm1, %v455_v13, %v457_v39 }
  0xa3   : > { %1489 = vmatprep.subr.msk.bf16.mxu1 %vm462_vm2, %v461_v43  ;;  %v489_v44 = vsel %vm462_vm2, %v411_v41, %v423_v42  ;;  %v563_v45 = vsel %vm462_vm2, %v461_v43, 0 }
  0xa4   : > { %576 = vmatpush1.bf16.msra.mxu0 %v489_v44  ;;  %1468 = vmatpush3.bf16.msra.mxu1 %v563_v45 }
  0xa5   : > { %v384_v46 = vpop.permute.xlu1 %383  ;;  %v382_v47 = vpop.permute.xlu0 %381 }
  0xa6   : > { %v387_v50 = vsel %vm385_vm7, %v382_v47, %v384_v46 }
  0xa9   : > { %v395_v48 = vpop.permute.xlu1 %394  ;;  %v393_v49 = vpop.permute.xlu0 %392 }
  0xaa   : > { %v400_v51 = vsel %vm398_vm8, %v393_v49, %v395_v48 }
  0xab   : > { %v481_v52 = vsel %vm462_vm2, %v387_v50, %v400_v51 }
  0xac   : > { %577 = vmatprep.subr.bf16.mxu0 %v481_v52 }
  0xad   : > { %v391_v53 = vpop.permute.xlu1 %390  ;;  %v380_v54 = vpop.permute.xlu0 %379 }
  0xae   : > { %v399_v55 = vsel %vm398_vm8, %v391_v53, %v393_v49  ;;  %v386_v56 = vsel %vm385_vm7, %v380_v54, %v382_v47 }
  0xaf   : > { %v477_v57 = vsel %vm462_vm2, %v386_v56, %v399_v55 }
  0xb0   : > { %578 = vmatpush1.bf16.msra.mxu0 %v477_v57 }
  0xb1   : > { %v445_v58 = vpop.permute.xlu1 %444  ;;  %v433_v59 = vpop.permute.xlu0 %432 }
  0xb2   : > { %v449_v60 = vsel %vm446_vm4, %v443_v23, %v445_v58  ;;  %v437_v61 = vsel %vm434_vm3, %v431_v21, %v433_v59 }
  0xb3   : > { %v509_v62 = vsel %vm462_vm2, %v437_v61, %v449_v60 }
  0xb4   : > { %1469 = vmatprep.subr.bf16.mxu1 %v509_v62 }
  0xb5   : > { %v375_v63 = vpop.permute.xlu1 %374  ;;  %1470 = vmatpush3.bf16.msra.mxu1 %v509_v62  ;;  %v373_v0 = vpop.permute.xlu0 %372 }
  0xb6   : > { %v378_v1 = vsel %vm376_vm9, %v373_v0, %v375_v63  ;;  %v473_v18 = vsel %vm462_vm2, %v1647_v3, %v375_v63 }
  0xb7   : > { %v469_v2 = vsel %vm462_vm2, %v1655_v5, %v378_v1 }
  0xb8   : > { %579 = vmatprep.subr.bf16.mxu0 %v469_v2 }
  0xb9   : > { %v409_v6 = vpop.permute.xlu1 %408  ;;  %v371_v9 = vpop.permute.xlu0 %370 }
  0xba   : > { %v377_v10 = vsel %vm376_vm9, %v371_v9, %v373_v0  ;;  %v413_v14 = vsel %vm410_vm5, %v407_v33, %v409_v6 }
  0xbb   : > { %v465_v11 = vsel %vm462_vm2, %v1649_v4, %v377_v10 }
  0xbc   : > { %580 = vmatpush1.bf16.msra.mxu0 %v465_v11 }
  0xbd   : > { %v397_v12 = vpop.permute.xlu1 %396  ;;  %v421_v13 = vpop.permute.xlu0 %420 }
  0xbe   : > { %v401_v15 = vsel %vm398_vm8, %v395_v48, %v397_v12  ;;  %v425_v16 = vsel %vm422_vm6, %v419_v35, %v421_v13 }
  0xbf   : > { %1411 = vmatmul.mubr.msk.bf16.vlgmr.msra.gmra.mxu0 %vm549_vm0, %v1700_v8  ;;  %v497_v5 = vsel %vm462_vm2, %v413_v14, %v425_v16  ;;  %v485_v4 = vsel %vm462_vm2, %v384_v46, %v401_v15  ;;  %v681_v8 = vlaneseq }
  0xc0   : > { %1471 = vmatprep.subr.bf16.mxu1 %v497_v5  ;;  %607 = vmatprep.mubr.bf16.mxu0 %v1572_v7 }
  0xc1   : > { %1472 = vmatpush3.bf16.msra.mxu1 %v497_v5  ;;  %v1782_v20 = vshrl.u32 %v681_v8, 7  ;;  %vm1291_vm12 = vcmp.lt.s32.totalorder %v681_v8, 320 }
  0xc2   : > { %1473 = vmatprep.subr.bf16.mxu1 %v485_v4 }
  0xc3   : > { %v683_v23 = vsub.s32 0, %v1782_v20  ;;  %v691_v38 = vsub.s32 2, %v1782_v20  ;;  %v687_v51 = vsub.s32 1, %v1782_v20 }
  0xc5   : > { %1474 = vmatpush3.bf16.msra.mxu1 %v485_v4  ;;  %v684_v28 = vrot.slane %v679_v24, %v683_v23  ;;  %v692_v44 = vrot.slane %v679_v24, %v691_v38  ;;  %v688_v61 = vrot.slane %v679_v24, %v687_v51  ;;  %v1887_v24 = vld [vmem:[%s2066_s4 + $0x4] ss:$12 sps:$4 sm:$0xff]  }
  0xc6   : > { %1475 = vmatprep.subr.bf16.mxu1 %v473_v18 }
  0xc7   : > { %1412 = vmatmul.mubr.msk.bf16.gmra.mxu0 %vm549_vm0, %v1532_v17 }
  0xc8   : > { %997 = vmatprep.mubr.bf16.mxu0 %v1887_v24 }
  0xc9   : > { %1476 = vmatpush3.bf16.msra.mxu1 %v473_v18 }
  0xca   : > { %v1779_v19 = vpop.permute.xlu1 %536  ;;  %v1784_v21 = vpop.permute.xlu0 %531 }
  0xcc   : > { %1478 = vmatmul.mubr.msk.bf16.vlgmr.msra.gmra.mxu1 %vm549_vm0, %v1532_v17 }
  0xcd   : > { %1050 = vmatprep.mubr.bf16.mxu1 %v1572_v7 }
  0xce   : > { %v522_v22 = vpop.permute.xlu1 %521  ;;  %v527_v27 = vpop.permute.xlu0 %526 }
 0x17f   : > { %v599_v3 = vpop.f32.mrf.mxu0 }
 0x180   : > { %v600_v25 = vadd.f32 %v599_v3, %v522_v22 }
 0x181   : > { %v601_v26 = vpop.f32.mrf.mxu0 }
 0x182   : > { %v667_v29 = vmax.f32 %v600_v25, 0.0  ;;  %v602_v52 = vadd.f32 %v601_v26, %v522_v22  ;;  %v904_v25 = vld [vmem:[%s2067_s5] sm:$0xff]  ;;  %v905_v26 = vld [vmem:[%s2067_s5 + $0x8] sm:$0xff] }
 0x183   : > { %v603_v30 = vpop.f32.mrf.mxu0 }
 0x184   : > { %v604_v31 = vadd.f32 %v603_v30, %v527_v27  ;;  %v696_v32 = vmul.f32 %v684_v28, %v667_v29  ;;  %v668_v62 = vmax.f32 %v602_v52, 0.0  ;;  %v1181_v29 = vld [vmem:[%s2068_s6] sm:$0xff]  ;;  %v1182_v30 = vld [vmem:[%s2068_s6 + $0x8] sm:$0xff] }
 0x185   : > { %v605_v39 = vpop.f32.mrf.mxu0 }
 0x186   : > { %v670_v33 = vmax.f32 %v604_v31, 0.0  ;;  %v606_v53 = vadd.f32 %v605_v39, %v527_v27  ;;  %v697_v6 = vmul.f32 %v688_v61, %v668_v62  ;;  %v1183_v31 = vld [vmem:[%s2068_s6 + $0x10] sm:$0xff] }
 0x187   : > { %v609_v46 = vpop.f32.mrf.mxu0 }
 0x188   : > { %v699_v34 = vmul.f32 %v684_v28, %v670_v33  ;;  %v671_v63 = vmax.f32 %v606_v53, 0.0  ;;  %v610_v2 = vadd.f32 %v609_v46, %v1784_v21  ;;  %v1249_v33 = vld [vmem:[#allocation2] sm:$0x1] }
 0x189   : > { %v611_v57 = vpop.f32.mrf.mxu0 }
 0x18a   : > { %v1792_v35 = vpack.c.bf16 %v699_v34, %v696_v32  ;;  %v700_v10 = vmul.f32 %v688_v61, %v671_v63  ;;  %v673_v11 = vmax.f32 %v610_v2, 0.0  ;;  %v612_v17 = vadd.f32 %v611_v57, %v1784_v21  ;;  %v1184_v32 = vld [vmem:[%s2068_s6 + $0x18] sm:$0xff] }
 0x18b   : > { %v613_v1 = vpop.f32.mrf.mxu0 }
 0x18c   : > { %v1479_v36 = vpop.f32.mrf.mxu1  ;;  %874 = vrot.lane.b32.xlu1 %v1792_v35, %s1565_s14  ;;  %v614_v9 = vadd.f32 %v613_v1, %v1779_v19  ;;  %v1814_v13 = vpack.c.bf16 %v700_v10, %v697_v6  ;;  %v702_v14 = vmul.f32 %v684_v28, %v673_v11 }
 0x18d   : > { %v661_v37 = vadd.f32 %v1479_v36, %v1784_v21  ;;  %v615_v16 = vpop.f32.mrf.mxu0 }
 0x18e   : > { %v652_v40 = vpop.f32.mrf.mxu1  ;;  %v676_v12 = vmax.f32 %v614_v9, 0.0  ;;  %v616_v4 = vadd.f32 %v615_v16, %v1779_v19 }
 0x18f   : > { %v653_v41 = vadd.f32 %v652_v40, %v522_v22  ;;  %v675_v43 = vmax.f32 %v661_v37, 0.0  ;;  %v674_v22 = vmax.f32 %v612_v17, 0.0 }
 0x190   : > { %v1480_v42 = vpop.f32.mrf.mxu1  ;;  %v705_v15 = vmul.f32 %v684_v28, %v676_v12  ;;  %v677_v18 = vmax.f32 %v616_v4, 0.0  ;;  %v907_v28 = vld [vmem:[%s2067_s5 + $0x18] sm:$0xff] }
 0x191   : > { %v664_v45 = vadd.f32 %v1480_v42, %v1779_v19  ;;  %v669_v48 = vmax.f32 %v653_v41, 0.0  ;;  %v704_v54 = vmul.f32 %v692_v44, %v675_v43  ;;  %v703_v19 = vmul.f32 %v688_v61, %v674_v22 }
 0x192   : > { %v655_v47 = vpop.f32.mrf.mxu1  ;;  %v1824_v5 = vpack.c.bf16 %v705_v15, %v702_v14  ;;  %v706_v3 = vmul.f32 %v688_v61, %v677_v18  ;;  %v1975_v18 = vld [vmem:[%s2066_s4 + $0x8] ss:$12 sps:$4 sm:$0xff]  }
 0x193   : > { %v678_v49 = vmax.f32 %v664_v45, 0.0  ;;  %v656_v50 = vadd.f32 %v655_v47, %v527_v27  ;;  %v698_v58 = vmul.f32 %v692_v44, %v669_v48  ;;  %v906_v27 = vld [vmem:[%s2067_s5 + $0x10] sm:$0xff] }
 0x194   : > { %v1840_v21 = vpack.c.bf16 %v706_v3, %v703_v19 }
 0x195   : > { %v707_v55 = vmul.f32 %v692_v44, %v678_v49  ;;  %v672_v56 = vmax.f32 %v656_v50, 0.0 }
 0x197   : > { %v1800_v59 = vpack.c.bf16 %v707_v55, %v704_v54  ;;  %v701_v60 = vmul.f32 %v692_v44, %v672_v56 }
 0x199   : > { %v1802_v0 = vpack.c.bf16 %v701_v60, %v698_v58  ;;  %774 = vrot.lane.b32.xlu0 %v1800_v59, %s1571_s20 }
 0x19b   : > { %768 = vrot.lane.b32.xlu1 %v1802_v0, %s1571_s20 }
 0x19d   : > { %764 = vrot.lane.b32.xlu0 %v1792_v35, %s1571_s20 }
 0x19f   : > { %746 = vrot.lane.b32.xlu1 %v1802_v0, %s1570_s19 }
 0x1a1   : > { %752 = vrot.lane.b32.xlu0 %v1800_v59, %s1570_s19 }
 0x1a3   : > { %876 = vrot.lane.b32.xlu1 %v1814_v13, %s1565_s14 }
 0x1a5   : > { %742 = vrot.lane.b32.xlu0 %v1792_v35, %s1570_s19 }
 0x1a7   : > { %722 = vrot.lane.b32.xlu1 %v1814_v13, %s1573_s23 }
 0x1a9   : > { %884 = vrot.lane.b32.xlu0 %v1800_v59, %s1565_s14 }
 0x1ab   : > { %770 = vrot.lane.b32.xlu1 %v1824_v5, %s1571_s20 }
 0x1ad   : > { %730 = vrot.lane.b32.xlu0 %v1800_v59, %s1573_s23 }
 0x1af   : > { %748 = vrot.lane.b32.xlu1 %v1824_v5, %s1570_s19 }
 0x1b1   : > { %720 = vrot.lane.b32.xlu0 %v1792_v35, %s1573_s23 }
 0x1b3   : > { %880 = vrot.lane.b32.xlu1 %v1824_v5, %s1565_s14 }
 0x1b5   : > { %766 = vrot.lane.b32.xlu0 %v1814_v13, %s1571_s20 }
 0x1b7   : > { %772 = vrot.lane.b32.xlu1 %v1840_v21, %s1571_s20 }
 0x1b9   : > { %744 = vrot.lane.b32.xlu0 %v1814_v13, %s1570_s19 }
 0x1bb   : > { %862 = vrot.lane.b32.xlu1 %v1800_v59, %s1567_s16 }
 0x1bd   : > { %878 = vrot.lane.b32.xlu0 %v1802_v0, %s1565_s14 }
 0x1bf   : > { %750 = vrot.lane.b32.xlu1 %v1840_v21, %s1570_s19 }
 0x1c1   : > { %724 = vrot.lane.b32.xlu0 %v1802_v0, %s1573_s23 }
 0x1c3   : > { %882 = vrot.lane.b32.xlu1 %v1840_v21, %s1565_s14 }
 0x1c5   : > { %726 = vrot.lane.b32.xlu0 %v1824_v5, %s1573_s23 }
 0x1c7   : > { %728 = vrot.lane.b32.xlu1 %v1840_v21, %s1573_s23 }
 0x1c9   : > { %856 = vrot.lane.b32.xlu0 %v1802_v0, %s1567_s16 }
 0x1cb   : > { %840 = vrot.lane.b32.xlu1 %v1800_v59, %s1566_s15 }
 0x1cd   : > { %834 = vrot.lane.b32.xlu0 %v1802_v0, %s1566_s15 }
 0x1cf   : > { %858 = vrot.lane.b32.xlu1 %v1824_v5, %s1567_s16 }
 0x1d1   : > { %852 = vrot.lane.b32.xlu0 %v1792_v35, %s1567_s16 }
 0x1d3   : > { %854 = vrot.lane.b32.xlu1 %v1814_v13, %s1567_s16 }
 0x1d5   : > { %860 = vrot.lane.b32.xlu0 %v1840_v21, %s1567_s16 }
 0x1d7   : > { %818 = vrot.lane.b32.xlu1 %v1800_v59, %s1569_s18 }
 0x1d9   : > { %812 = vrot.lane.b32.xlu0 %v1802_v0, %s1569_s18 }
 0x1db   : > { %836 = vrot.lane.b32.xlu1 %v1824_v5, %s1566_s15 }
 0x1dd   : > { %838 = vrot.lane.b32.xlu0 %v1840_v21, %s1566_s15 }
 0x1df   : > { %832 = vrot.lane.b32.xlu1 %v1814_v13, %s1566_s15 }
 0x1e1   : > { %830 = vrot.lane.b32.xlu0 %v1792_v35, %s1566_s15 }
 0x1e3   : > { %796 = vrot.lane.b32.xlu1 %v1800_v59, %s1568_s17 }
 0x1e5   : > { %816 = vrot.lane.b32.xlu0 %v1840_v21, %s1569_s18 }
 0x1e7   : > { %814 = vrot.lane.b32.xlu1 %v1824_v5, %s1569_s18 }
 0x1e9   : > { %790 = vrot.lane.b32.xlu0 %v1802_v0, %s1568_s17 }
 0x1eb   : > { %810 = vrot.lane.b32.xlu1 %v1814_v13, %s1569_s18 }
 0x1ed   : > { %808 = vrot.lane.b32.xlu0 %v1792_v35, %s1569_s18 }
 0x1ef   : > { %794 = vrot.lane.b32.xlu1 %v1840_v21, %s1568_s17 }
 0x1f1   : > { %792 = vrot.lane.b32.xlu0 %v1824_v5, %s1568_s17 }
 0x1f3   : > { %788 = vrot.lane.b32.xlu1 %v1814_v13, %s1568_s17 }
 0x1f5   : > { %786 = vrot.lane.b32.xlu0 %v1792_v35, %s1568_s17  ;;  %s358_s17 = scalar_lea.vmem %s2070_s8, %s1490_s27 }
 0x1f7   : > { %910 = vperm.xlu1 %1526, %v904_v25  }
 0x1f9   : > { %915 = vperm.xlu0 %1525, %v905_v26  }
 0x1fb   : > { %920 = vperm.xlu1 %1526, %v906_v27  }
 0x1fd   : > { %925 = vperm.xlu0 %1525, %v907_v28   ;;  %v1987_v28 = vld [vmem:[%s2066_s4 + $0x20] ss:$12 sps:$4 sm:$0xff]  }
 0x1fe   : > { %v875_v34 = vpop.permute.xlu1 %874 }
 0x1ff   : > { %1187 = vperm.xlu1 %1526, %v1181_v29  }
 0x201   : > { %1192 = vperm.xlu0 %1525, %v1182_v30  }
 0x203   : > { %1197 = vperm.xlu1 %1526, %v1183_v31  }
 0x205   : > { %1202 = vperm.xlu0 %1525, %v1184_v32  }
 0x207   : > { %1252 = vperm.xlu1 %1526, %v1249_v33  }
 0x20b   : > { %v775_v36 = vpop.permute.xlu0 %774 }
 0x20d   : > { %v1938_v37 = vpop.permute.xlu1 %768 }
 0x20f   : > { %v765_v38 = vpop.permute.xlu0 %764 }
 0x211   : > { %v1940_v39 = vpop.permute.xlu1 %746 }
 0x213   : > { %v1942_v40 = vpop.permute.xlu0 %752 }
 0x215   : > { %v877_v41 = vpop.permute.xlu1 %876 }
 0x216   : > { %v886_v4 = vsel %vm458_vm1, %v875_v34, %v877_v41 }
 0x217   : > { %v743_v42 = vpop.permute.xlu0 %742 }
 0x219   : > { %v723_v43 = vpop.permute.xlu1 %722 }
 0x21b   : > { %v1944_v44 = vpop.permute.xlu0 %884 }
 0x21d   : > { %v771_v45 = vpop.permute.xlu1 %770 }
 0x21f   : > { %v1946_v46 = vpop.permute.xlu0 %730 }
 0x221   : > { %v749_v47 = vpop.permute.xlu1 %748 }
 0x223   : > { %v721_v48 = vpop.permute.xlu0 %720 }
 0x224   : > { %v732_v19 = vsel %vm376_vm9, %v721_v48, %v723_v43 }
 0x225   : > { %v881_v49 = vpop.permute.xlu1 %880 }
 0x227   : > { %v767_v50 = vpop.permute.xlu0 %766 }
 0x228   : > { %v777_v55 = vsel %vm398_vm8, %v767_v50, %v1938_v37  ;;  %v776_v57 = vsel %vm398_vm8, %v765_v38, %v767_v50 }
 0x229   : > { %v773_v51 = vpop.permute.xlu1 %772 }
 0x22a   : > { %v778_v52 = vsel %vm398_vm8, %v771_v45, %v773_v51  ;;  %v779_v53 = vsel %vm398_vm8, %v773_v51, %v775_v36 }
 0x22b   : > { %965 = vmatprep.subr.bf16.mxu0 %v779_v53  ;;  %v745_v54 = vpop.permute.xlu0 %744 }
 0x22c   : > { %966 = vmatpush1.bf16.msra.mxu0 %v778_v52  ;;  %v755_v1 = vsel %vm385_vm7, %v745_v54, %v1940_v39  ;;  %v754_v10 = vsel %vm385_vm7, %v743_v42, %v745_v54 }
 0x22d   : > { %v863_v56 = vpop.permute.xlu1 %862  ;;  %967 = vmatprep.subr.bf16.mxu0 %v777_v55  ;;  %v1540_v55 = vld [vmem:[%s2066_s4 + $0x18] ss:$12 sps:$4 sm:$0xff]  }
 0x22f   : > { %v1953_v58 = vpop.permute.xlu0 %878 }
 0x230   : > { %968 = vmatpush1.bf16.msra.mxu0 %v776_v57  ;;  %v887_v12 = vsel %vm458_vm1, %v877_v41, %v1953_v58 }
 0x231   : > { %v751_v60 = vpop.permute.xlu1 %750 }
 0x232   : > { %v756_v61 = vsel %vm385_vm7, %v749_v47, %v751_v60  ;;  %v757_v62 = vsel %vm385_vm7, %v751_v60, %v1942_v40  ;;  %v1535_v47 = vld [vmem:[%s2066_s4] ss:$12 sps:$4 sm:$0xff]  }
 0x233   : > { %969 = vmatprep.subr.bf16.mxu0 %v757_v62  ;;  %v1958_v63 = vpop.permute.xlu0 %724 }
 0x234   : > { %970 = vmatpush1.bf16.msra.mxu0 %v756_v61  ;;  %v733_v22 = vsel %vm376_vm9, %v723_v43, %v1958_v63 }
 0x235   : > { %v883_v2 = vpop.permute.xlu1 %882  ;;  %971 = vmatprep.subr.bf16.mxu0 %v755_v1 }
 0x236   : > { %v888_v6 = vsel %vm458_vm1, %v881_v49, %v883_v2  ;;  %v889_v9 = vsel %vm458_vm1, %v883_v2, %v1944_v44  ;;  %v1538_v49 = vld [vmem:[%s2066_s4 + $0x1c] ss:$12 sps:$4 sm:$0xff]  }
 0x237   : > { %1030 = vmatprep.subr.bf16.mxu1 %v889_v9  ;;  %v727_v11 = vpop.permute.xlu0 %726 }
 0x238   : > { %972 = vmatpush1.bf16.msra.mxu0 %v754_v10  ;;  %1031 = vmatpush1.bf16.msra.mxu1 %v888_v6 }
 0x239   : > { %v729_v14 = vpop.permute.xlu1 %728  ;;  %1032 = vmatprep.subr.bf16.mxu1 %v887_v12 }
 0x23a   : > { %v734_v15 = vsel %vm376_vm9, %v727_v11, %v729_v14  ;;  %v735_v16 = vsel %vm376_vm9, %v729_v14, %v1946_v46 }
 0x23b   : > { %973 = vmatprep.subr.bf16.mxu0 %v735_v16  ;;  %v857_v17 = vpop.permute.xlu0 %856 }
 0x23c   : > { %974 = vmatpush1.bf16.msra.mxu0 %v734_v15  ;;  %1033 = vmatpush1.bf16.msra.mxu1 %v886_v4 }
 0x23d   : > { %v841_v3 = vpop.permute.xlu1 %840  ;;  %975 = vmatprep.subr.bf16.mxu0 %v733_v22  ;;  %1435 = vmatprep.subr.bf16.mxu1 %v863_v56 }
 0x23f   : > { %1421 = vmatmul.mubr.msk.bf16.vlgmr.msra.gmra.mxu1 %vm958_vm10, %v1975_v18  ;;  %v835_v25 = vpop.permute.xlu0 %834 }
 0x240   : > { %976 = vmatpush1.bf16.msra.mxu0 %v732_v19  ;;  %1436 = vmatpush3.bf16.msra.mxu1 %v775_v36 }
 0x241   : > { %v859_v26 = vpop.permute.xlu1 %858  ;;  %977 = vmatprep.subr.bf16.mxu0 %v1840_v21  ;;  %1437 = vmatprep.subr.bf16.mxu1 %v857_v17 }
 0x242   : > { %1060 = vmatprep.mubr.bf16.mxu1 %v1572_v7 }
 0x243   : > { %v853_v27 = vpop.permute.xlu0 %852 }
 0x244   : > { %978 = vmatpush1.bf16.msra.mxu0 %v1824_v5  ;;  %1438 = vmatpush3.bf16.msra.mxu1 %v1938_v37 }
 0x245   : > { %v855_v29 = vpop.permute.xlu1 %854  ;;  %979 = vmatprep.subr.bf16.mxu0 %v1814_v13  ;;  %1439 = vmatprep.subr.bf16.mxu1 %v841_v3 }
 0x246   : > { %v865_v13 = vsel %vm446_vm4, %v855_v29, %v857_v17 }
 0x247   : > { %v861_v30 = vpop.permute.xlu0 %860  ;;  %1422 = vmatmul.mubr.msk.bf16.gmra.mxu1 %vm958_vm10, %v1987_v28 }
 0x248   : > { %980 = vmatpush1.bf16.msra.mxu0 %v1792_v35  ;;  %1440 = vmatpush3.bf16.msra.mxu1 %v1942_v40  ;;  %v867_v7 = vsel %vm446_vm4, %v861_v30, %v863_v56  ;;  %v866_v5 = vsel %vm446_vm4, %v859_v26, %v861_v30  ;;  %v864_v35 = vsel %vm446_vm4, %v853_v27, %v855_v29 }
 0x249   : > { %v819_v21 = vpop.permute.xlu1 %818  ;;  %981 = vmatprep.subr.bf16.mxu0 %v867_v7  ;;  %1441 = vmatprep.subr.bf16.mxu1 %v835_v25 }
 0x24a   : > { %1103 = vmatprep.mubr.bf16.mxu1 %v1887_v24 }
 0x24b   : > { %v813_v31 = vpop.permute.xlu0 %812 }
 0x24c   : > { %982 = vmatpush2.bf16.msra.mxu0 %v866_v5  ;;  %1442 = vmatpush3.bf16.msra.mxu1 %v1940_v39 }
 0x24d   : > { %v837_v32 = vpop.permute.xlu1 %836  ;;  %983 = vmatprep.subr.bf16.mxu0 %v865_v13  ;;  %1443 = vmatprep.subr.bf16.mxu1 %v819_v21 }
 0x24f   : > { %v839_v33 = vpop.permute.xlu0 %838 }
 0x250   : > { %984 = vmatpush2.bf16.msra.mxu0 %v864_v35  ;;  %1444 = vmatpush3.bf16.msra.mxu1 %v1946_v46  ;;  %v845_v34 = vsel %vm434_vm3, %v839_v33, %v841_v3  ;;  %v844_v36 = vsel %vm434_vm3, %v837_v32, %v839_v33 }
 0x251   : > { %v833_v24 = vpop.permute.xlu1 %832  ;;  %985 = vmatprep.subr.bf16.mxu0 %v845_v34  ;;  %1445 = vmatprep.subr.bf16.mxu1 %v813_v31 }
 0x252   : > { %v843_v38 = vsel %vm434_vm3, %v833_v24, %v835_v25 }
 0x253   : > { %v831_v37 = vpop.permute.xlu0 %830 }
 0x254   : > { %986 = vmatpush2.bf16.msra.mxu0 %v844_v36  ;;  %1446 = vmatpush3.bf16.msra.mxu1 %v1958_v63  ;;  %v842_v40 = vsel %vm434_vm3, %v831_v37, %v833_v24 }
 0x255   : > { %v797_v39 = vpop.permute.xlu1 %796  ;;  %987 = vmatprep.subr.bf16.mxu0 %v843_v38 }
 0x256   : > { %1447 = vmatprep.subr.bf16.mxu1 %v797_v39 }
 0x257   : > { %v817_v41 = vpop.permute.xlu0 %816 }
 0x258   : > { %988 = vmatpush2.bf16.msra.mxu0 %v842_v40  ;;  %1448 = vmatpush3.bf16.msra.mxu1 %v1800_v59  ;;  %v823_v42 = vsel %vm422_vm6, %v817_v41, %v819_v21 }
 0x259   : > { %v815_v43 = vpop.permute.xlu1 %814  ;;  %989 = vmatprep.subr.bf16.mxu0 %v823_v42 }
 0x25a   : > { %v822_v45 = vsel %vm422_vm6, %v815_v43, %v817_v41 }
 0x25b   : > { %v791_v46 = vpop.permute.xlu0 %790 }
 0x25c   : > { %990 = vmatpush2.bf16.msra.mxu0 %v822_v45  ;;  %1449 = vmatprep.subr.bf16.mxu1 %v791_v46 }
 0x25d   : > { %v811_v48 = vpop.permute.xlu1 %810  ;;  %1450 = vmatpush3.bf16.msra.mxu1 %v1802_v0 }
 0x25e   : > { %1481 = vmatprep.subr.bf16.mxu1 %v1944_v44  ;;  %v821_v59 = vsel %vm422_vm6, %v811_v48, %v813_v31 }
 0x25f   : > { %991 = vmatprep.subr.bf16.mxu0 %v821_v59  ;;  %v809_v50 = vpop.permute.xlu0 %808 }
 0x260   : > { %v820_v51 = vsel %vm422_vm6, %v809_v50, %v811_v48  ;;  %1104 = vmatmul.mubr.bf16.vlgmr.msra.gmra.mxu1 %v1535_v47 }
 0x261   : > { %v795_v52 = vpop.permute.xlu1 %794  ;;  %992 = vmatpush2.bf16.msra.mxu0 %v820_v51  ;;  %1482 = vmatpush3.bf16.msra.mxu1 %v1944_v44 }
 0x262   : > { %1483 = vmatprep.subr.bf16.mxu1 %v1953_v58  ;;  %v801_v0 = vsel %vm410_vm5, %v795_v52, %v797_v39  ;;  %1111 = vmatprep.mubr.bf16.mxu1 %v1538_v49 }
 0x263   : > { %993 = vmatprep.subr.bf16.mxu0 %v801_v0  ;;  %v793_v53 = vpop.permute.xlu0 %792 }
 0x264   : > { %v800_v54 = vsel %vm410_vm5, %v793_v53, %v795_v52 }
 0x265   : > { %v789_v56 = vpop.permute.xlu1 %788  ;;  %994 = vmatpush2.bf16.msra.mxu0 %v800_v54  ;;  %1484 = vmatpush3.bf16.msra.mxu1 %v1953_v58 }
 0x266   : > { %v799_v57 = vsel %vm410_vm5, %v789_v56, %v791_v46 }
 0x267   : > { %995 = vmatprep.subr.bf16.mxu0 %v799_v57  ;;  %v787_v44 = vpop.permute.xlu0 %786 }
 0x268   : > { %v798_v60 = vsel %vm410_vm5, %v787_v44, %v789_v56  ;;  %1112 = vmatmul.mubr.bf16.gmra.mxu1 %v1540_v55 }
 0x269   : > { %996 = vmatpush2.bf16.msra.mxu0 %v798_v60  ;;  %1485 = vmatprep.mubr.msk.bf16.mxu1 %vm958_vm10, %v1975_v18 }
 0x26c   : > { %998 = vmatmul.mubr.bf16.vlgmr.msra.gmra.mxu0 %v1535_v47 }
 0x26d   : > { %1007 = vmatprep.mubr.bf16.mxu0 %v1538_v49 }
 0x270   : > { %1486 = vmatmul.mubr.msk.bf16.vlgmr.msra.gmra.mxu1 %vm958_vm10, %v1987_v28 }
 0x272   : > { %v911_v15 = vpop.permute.xlu1 %910 }
 0x274   : > { %1008 = vmatmul.mubr.bf16.gmra.mxu0 %v1540_v55  ;;  %v916_v17 = vpop.permute.xlu0 %915 }
 0x276   : > { %v921_v3 = vpop.permute.xlu1 %920 }
 0x278   : > { %v926_v31 = vpop.permute.xlu0 %925 }
 0x27a   : > { %v1188_v36 = vpop.permute.xlu1 %1187 }
 0x27c   : > { %v1193_v53 = vpop.permute.xlu0 %1192 }
 0x2ff   : > { %v1052_v61 = vpop.f32.mrf.mxu1 }
 0x301   : > { %v1054_v62 = vpop.f32.mrf.mxu1 }
 0x303   : > { %v1056_v58 = vpop.f32.mrf.mxu1 }
 0x305   : > { %v1058_v63 = vpop.f32.mrf.mxu1 }
 0x307   : > { %v1062_v1 = vpop.f32.mrf.mxu1 }
 0x309   : > { %v1064_v2 = vpop.f32.mrf.mxu1 }
 0x30b   : > { %v2035_v6 = vpop.f32.mrf.mxu1 }
 0x30d   : > { %v2037_v9 = vpop.f32.mrf.mxu1 }
 0x320   : > { %v1451_v10 = vpop.f32.mrf.mxu1 }
 0x322   : > { %v1452_v11 = vpop.f32.mrf.mxu1 }
 0x323   : > { %v1453_v25 = vadd.f32 %v1452_v11, %v1451_v10 }
 0x324   : > { %v1454_v12 = vpop.f32.mrf.mxu1 }
 0x325   : > { %v1106_v34 = vadd.f32 %v1453_v25, %v911_v15 }
 0x326   : > { %v1455_v14 = vpop.f32.mrf.mxu1 }
 0x327   : > { %v1456_v32 = vadd.f32 %v1455_v14, %v1454_v12  ;;  %v1198_v14 = vpop.permute.xlu1 %1197 }
 0x328   : > { %v1457_v16 = vpop.f32.mrf.mxu1 }
 0x329   : > { %v1109_v52 = vadd.f32 %v1456_v32, %v916_v17 }
 0x32a   : > { %v1458_v4 = vpop.f32.mrf.mxu1 }
 0x32b   : > { %v1459_v26 = vadd.f32 %v1458_v4, %v1457_v16 }
 0x32c   : > { %v999_v18 = vpop.f32.mrf.mxu0  ;;  %v1460_v22 = vpop.f32.mrf.mxu1 }
 0x32d   : > { %v1000_v19 = vadd.f32 %v999_v18, %v911_v15  ;;  %v1114_v35 = vadd.f32 %v1459_v26, %v921_v3 }
 0x32e   : > { %v1001_v27 = vpop.f32.mrf.mxu0  ;;  %v1461_v28 = vpop.f32.mrf.mxu1 }
 0x32f   : > { %v1053_v29 = vadd.f32 %v1052_v61, %v1000_v19  ;;  %v1002_v30 = vadd.f32 %v1001_v27, %v911_v15  ;;  %v1462_v7 = vadd.f32 %v1461_v28, %v1460_v22  ;;  %v1203_v27 = vpop.permute.xlu0 %1202 }
 0x330   : > { %v1003_v21 = vpop.f32.mrf.mxu0  ;;  %v1487_v5 = vpop.f32.mrf.mxu1 }
 0x331   : > { %v1004_v13 = vadd.f32 %v1003_v21, %v916_v17  ;;  %v1169_v37 = vmax.f32 %v1053_v29, 0.0  ;;  %v1055_v38 = vadd.f32 %v1054_v62, %v1002_v30  ;;  %v1163_v40 = vadd.f32 %v1487_v5, %v1114_v35 }
 0x332   : > { %v1005_v33 = vpop.f32.mrf.mxu0  ;;  %v1154_v24 = vpop.f32.mrf.mxu1  ;;  %v1117_v45 = vadd.f32 %v1462_v7, %v926_v31 }
 0x333   : > { %v1057_v39 = vadd.f32 %v1056_v58, %v1004_v13  ;;  %v1006_v41 = vadd.f32 %v1005_v33, %v916_v17  ;;  %v1155_v42 = vadd.f32 %v1154_v24, %v1106_v34  ;;  %v1205_v54 = vmul.f32 %v1188_v36, %v1169_v37 }
 0x334   : > { %v1009_v43 = vpop.f32.mrf.mxu0  ;;  %v1488_v46 = vpop.f32.mrf.mxu1  ;;  %v1170_v57 = vmax.f32 %v1055_v38, 0.0  ;;  %v1177_v44 = vmax.f32 %v1163_v40, 0.0 }
 0x335   : > { %v1172_v47 = vmax.f32 %v1057_v39, 0.0  ;;  %v1010_v48 = vadd.f32 %v1009_v43, %v921_v3  ;;  %v1059_v59 = vadd.f32 %v1058_v63, %v1006_v41  ;;  %v1171_v49 = vmax.f32 %v1155_v42, 0.0 }
 0x336   : > { %v1166_v50 = vadd.f32 %v1488_v46, %v1117_v45  ;;  %v1011_v51 = vpop.f32.mrf.mxu0  ;;  %v1157_v0 = vpop.f32.mrf.mxu1  ;;  %v1206_v19 = vmul.f32 %v1188_v36, %v1170_v57  ;;  %v1213_v25 = vmul.f32 %v1198_v14, %v1177_v44 }
 0x337   : > { %v1063_v55 = vadd.f32 %v1062_v1, %v1010_v48  ;;  %v1012_v56 = vadd.f32 %v1011_v51, %v921_v3  ;;  %v1173_v60 = vmax.f32 %v1059_v59, 0.0  ;;  %v1158_v61 = vadd.f32 %v1157_v0, %v1109_v52 }
 0x338   : > { %v1013_v62 = vpop.f32.mrf.mxu0  ;;  %v1208_v58 = vmul.f32 %v1193_v53, %v1172_v47  ;;  %v1207_v15 = vmul.f32 %v1188_v36, %v1171_v49  ;;  %v1180_v16 = vmax.f32 %v1166_v50, 0.0  ;;  %v1239_v33 = vsel %vm1235_vm11, %v1213_v25, 0.0 }
 0x339   : > { %v1175_v10 = vmax.f32 %v1063_v55, 0.0  ;;  %v1065_v11 = vadd.f32 %v1064_v2, %v1012_v56  ;;  %v1014_v12 = vadd.f32 %v1013_v62, %v926_v31  ;;  %v1209_v63 = vmul.f32 %v1193_v53, %v1173_v60 }
 0x33a   : > { %v1174_v4 = vmax.f32 %v1158_v61, 0.0  ;;  %v1015_v17 = vpop.f32.mrf.mxu0  ;;  %v1217_v28 = vadd.f32 %v1208_v58, %v1205_v54  ;;  %v1236_v21 = vsel %vm1235_vm11, %v1207_v15, 0.0  ;;  %v1216_v5 = vmul.f32 %v1203_v27, %v1180_v16  ;;  %v1253_v54 = vpop.permute.xlu1 %1252 }
 0x33b   : > { %v1211_v18 = vmul.f32 %v1198_v14, %v1175_v10  ;;  %v1176_v22 = vmax.f32 %v1065_v11, 0.0  ;;  %v1067_v1 = vadd.f32 %v2035_v6, %v1014_v12  ;;  %v1016_v3 = vadd.f32 %v1015_v17, %v926_v31 }
 0x33c   : > { %v1210_v26 = vmul.f32 %v1193_v53, %v1174_v4  ;;  %v1226_v7 = vadd.f32 %v1209_v63, %v1206_v19  ;;  %v1241_v38 = vsel %vm1235_vm11, %v1216_v5, 0.0  ;;  %v1574_v59 = vmov 1966171168  }
 0x33d   : > { %v1212_v29 = vmul.f32 %v1198_v14, %v1176_v22  ;;  %v1178_v2 = vmax.f32 %v1067_v1, 0.0  ;;  %v1069_v30 = vadd.f32 %v2037_v9, %v1016_v3  ;;  %v1218_v32 = vadd.f32 %v1217_v28, %v1211_v18 }
 0x33e   : > { %v1237_v13 = vsel %vm1235_vm11, %v1210_v26, 0.0  ;;  %v1267_v49 = vunpack.c.l.s4 %v1574_v59  ;;  %v1258_v60 = vrot.slane %v1253_v54, %v683_v23 }
 0x33f   : > { %v1238_v35 = vadd.f32 %v1237_v13, %v1236_v21  ;;  %v1214_v6 = vmul.f32 %v1203_v27, %v1178_v2  ;;  %v1179_v31 = vmax.f32 %v1069_v30, 0.0  ;;  %v1227_v34 = vadd.f32 %v1226_v7, %v1212_v29 }
 0x340   : > { %v1268_v56 = vunpack.c.0.s8 %v1267_v49 }
 0x341   : > { %v1240_v24 = vadd.f32 %v1239_v33, %v1238_v35  ;;  %v1219_v36 = vadd.f32 %v1218_v32, %v1214_v6  ;;  %v1215_v37 = vmul.f32 %v1203_v27, %v1179_v31 }
 0x342   : > { %v1271_v10 = vsub.s32 %v1268_v56, %v1782_v20 }
 0x343   : > { %v1242_v39 = vadd.f32 %v1241_v38, %v1240_v24  ;;  %v1220_v9 = vrot.slane %v1219_v36, 4  ;;  %v1228_v40 = vadd.f32 %v1227_v34, %v1215_v37 }
 0x345   : > { %v1243_v41 = vrot.slane %v1242_v39, 4  ;;  %v1221_v42 = vadd.f32 %v1220_v9, %v1219_v36  ;;  %v1229_v43 = vrot.slane %v1228_v40, 4 }
 0x347   : > { %v1244_v45 = vadd.f32 %v1243_v41, %v1242_v39  ;;  %v1222_v46 = vrot.slane %v1221_v42, 2  ;;  %v1230_v47 = vadd.f32 %v1229_v43, %v1228_v40 }
 0x349   : > { %v1245_v48 = vrot.slane %v1244_v45, 2  ;;  %v1223_v50 = vadd.f32 %v1222_v46, %v1221_v42  ;;  %v1231_v51 = vrot.slane %v1230_v47, 2 }
 0x34b   : > { %v1246_v52 = vadd.f32 %v1245_v48, %v1244_v45  ;;  %v1224_v0 = vrot.slane %v1223_v50, 1  ;;  %v1232_v53 = vadd.f32 %v1231_v51, %v1230_v47 }
 0x34d   : > { %v1247_v55 = vrot.slane %v1246_v52, 1  ;;  %v1225_v57 = vadd.f32 %v1224_v0, %v1223_v50  ;;  %v1233_v44 = vrot.slane %v1232_v53, 1 }
 0x34f   : > { %v1248_v61 = vadd.f32 %v1247_v55, %v1246_v52  ;;  %v1234_v62 = vadd.f32 %v1233_v44, %v1232_v53  ;;  %v1259_v11 = vadd.f32 %v1258_v60, %v1225_v57 }
 0x351   : > { %v1261_v58 = vadd.f32 %v1258_v60, %v1248_v61  ;;  %v1260_v12 = vadd.f32 %v1258_v60, %v1234_v62 }
 0x353   : > { %v1265_v14 = vcombine.low %v1259_v11, %v1260_v12  ;;  %v1279_v63 = vrot.slane %v1261_v58, %v1271_v10 }
 0x355   : > { %v1272_v15 = vrot.slane %v1265_v14, %v1271_v10 }
 0x357   : > { %v1280_v16 = vcombine.low %v1272_v15, %v1279_v63 }
 0x359   : > { %v1287_v4 = vrot.slane %v1280_v16, %v1271_v10 }
 0x35b   : > { %1293 = vst.msk [vmem:[%s358_s17] sm:$0x7] %vm1291_vm12, %v1287_v4 }
 0x35c PF: > { %s20_s9 = sadd.s32 1, %s1563_s9   ;;  %s2071_s29 = smov %s1559_s30 }
 0x35d   : > { %p17_p5 = scmp.ge.s32.totalorder %s20_s9, 4   ;;  %s2072_s30 = smov %s2074_s7 }
 0x35f   :  { %19 = sbr.rel (!%p17_p5) target bundleno = 3 (0x3), region = 85 }

</bundles_post_ra>
